<compile_context>
chip_gen: v7x
topology: tpu7x:2x2x1
jax: 0.10.0
libtpu: 0.0.40
codegen_flags: <defaults>
</compile_context>

<pallas_src>
import functools

import jax
import jax.numpy as jnp
from jax import lax
from jax.experimental import pallas as pl
from jax.experimental.pallas import tpu as pltpu

block_size = 8      # T (max sequence length)
n_embd = 32         # C
num_heads = 4
head_size = 8       # num_heads * head_size == n_embd

_NEG_BIG = -1e30    # plain Python float -> jaxpr literal, NOT a captured constant


def mha_kernel(x_ref, wqkv_ref, wp_ref, bp_ref, o_ref, cat_ref, *, B, T, H, hs):
    """Single invocation: x_ref is (B*T, C); everything lives in VMEM."""
    x = x_ref[...]                               # (B*T, C)
    C = x.shape[1]
    scale = float(C) ** -0.5                     # Python float (weak-typed literal)

    # One fused projection for all heads and all of q/k/v:
    # (B*T, C) @ (C, 3*H*hs) -> (B*T, 3*H*hs); columns are [q_heads | k_heads | v_heads]
    qkv = jnp.dot(x, wqkv_ref[...], preferred_element_type=jnp.float32)

    # causal mask (tril) over one sequence
    row = lax.broadcasted_iota(jnp.int32, (T, T), 0)
    col = lax.broadcasted_iota(jnp.int32, (T, T), 1)
    causal = col <= row

    q_off, k_off, v_off = 0, H * hs, 2 * H * hs

    for b in range(B):                           # static unroll, B=2
        r0, r1 = b * T, (b + 1) * T
        for h in range(H):                       # static unroll, H=4
            c0, c1 = h * hs, (h + 1) * hs
            q = qkv[r0:r1, q_off + c0:q_off + c1]        # (T, hs)
            k = qkv[r0:r1, k_off + c0:k_off + c1]        # (T, hs)
            v = qkv[r0:r1, v_off + c0:v_off + c1]        # (T, hs)

            # q @ k.T without materializing a transpose: contract the hs axis.
            s = lax.dot_general(
                q, k,
                dimension_numbers=(((1,), (1,)), ((), ())),
                preferred_element_type=jnp.float32,
            ) * scale                                     # (T, T)
            s = jnp.where(causal, s, _NEG_BIG)

            m = jnp.max(s, axis=-1, keepdims=True)        # (T, 1)
            p = jnp.exp(s - m)                            # (T, T), unnormalized
            l = jnp.sum(p, axis=-1, keepdims=True)        # (T, 1)

            pv = jnp.dot(p, v, preferred_element_type=jnp.float32)   # (T, hs)
            # Normalize after PV: one (T,1) reciprocal instead of a (T,T) divide.
            pv = pv * pl.reciprocal(l)

            # Write directly into the head's lane slice of the concat buffer.
            cat_ref[r0:r1, c0:c1] = pv

    out = jnp.dot(cat_ref[...], wp_ref[...],
                  preferred_element_type=jnp.float32) + bp_ref[...]
    o_ref[...] = out.astype(o_ref.dtype)


def multi_head_attention(x, wk, wq, wv, wp, bp):
    B, T, C = x.shape
    H, _, hs = wk.shape

    # Host-side (XLA) layout plumbing: flatten batch*seq and pack Q|K|V weights
    # into a single (C, 3*H*hs) matrix.  Done once per call, outside the kernel.
    x_flat = x.reshape(B * T, C)

    def pack(w):  # (H, C, hs) -> (C, H*hs)
        return jnp.transpose(w, (1, 0, 2)).reshape(C, H * hs)

    w_qkv = jnp.concatenate([pack(wq), pack(wk), pack(wv)], axis=1)   # (C, 3*H*hs)

    kernel = functools.partial(mha_kernel, B=B, T=T, H=H, hs=hs)

    out_flat = pl.pallas_call(
        kernel,
        out_shape=jax.ShapeDtypeStruct((B * T, C), jnp.float32),
        grid_spec=pltpu.PrefetchScalarGridSpec(
            num_scalar_prefetch=0,
            grid=(1,),                              # single step: no per-batch grid overhead
            in_specs=[
                pl.BlockSpec((B * T, C), lambda i: (0, 0)),          # x (flattened)
                pl.BlockSpec((C, 3 * H * hs), lambda i: (0, 0)),     # fused QKV weights
                pl.BlockSpec((H * hs, C), lambda i: (0, 0)),         # proj weight (transposed)
                pl.BlockSpec((1, C), lambda i: (0, 0)),              # proj bias
            ],
            out_specs=pl.BlockSpec((B * T, C), lambda i: (0, 0)),
            scratch_shapes=[pltpu.VMEM((B * T, H * hs), jnp.float32)],  # concat buffer
        ),
        compiler_params=pltpu.CompilerParams(
            dimension_semantics=("arbitrary",)),
    )(x_flat, w_qkv, wp, bp)

    return out_flat.reshape(B, T, C)


def reference(x, wk, wq, wv, wp, bp):
    B, T, C = x.shape
    row = jnp.arange(T)[:, None]
    col = jnp.arange(T)[None, :]
    causal = col <= row
    outs = []
    for h in range(wk.shape[0]):
        k = x @ wk[h]
        q = x @ wq[h]
        v = x @ wv[h]
        wei = (q @ jnp.swapaxes(k, -1, -2)) * (C ** -0.5)
        wei = jnp.where(causal[None], wei, -jnp.inf)
        wei = jax.nn.softmax(wei, axis=-1)
        outs.append(wei @ v)
    cat = jnp.concatenate(outs, axis=-1)
    return cat @ wp + bp


if __name__ == "__main__":
    B, T, C, H, hs = 2, block_size, n_embd, num_heads, head_size
    key = jax.random.PRNGKey(0)
    k_x, k_k, k_q, k_v, k_p, k_b = jax.random.split(key, 6)

    # deterministic "nn.Linear"-style init (uniform, scaled by fan-in)
    x = jax.random.normal(k_x, (B, T, C), dtype=jnp.float32)
    lim_in = 1.0 / (C ** 0.5)
    wk = jax.random.uniform(k_k, (H, C, hs), jnp.float32, -lim_in, lim_in)
    wq = jax.random.uniform(k_q, (H, C, hs), jnp.float32, -lim_in, lim_in)
    wv = jax.random.uniform(k_v, (H, C, hs), jnp.float32, -lim_in, lim_in)
    lim_p = 1.0 / ((H * hs) ** 0.5)
    wp = jax.random.uniform(k_p, (H * hs, C), jnp.float32, -lim_p, lim_p)
    bp = jax.random.uniform(k_b, (1, C), jnp.float32, -lim_p, lim_p)

    out = multi_head_attention(x, wk, wq, wv, wp, bp)
    out = jax.block_until_ready(out)

    ref = reference(x, wk, wq, wv, wp, bp)
    assert out.shape == (B, T, C)
    assert jnp.allclose(out, ref, atol=1e-5, rtol=1e-5), "mismatch vs reference"
    print("KERNEL_OK")
</pallas_src>

<mosaic_0001>
module attributes {stable_mosaic.version = 11 : i64} {
  func.func @mha_kernel(%arg0: i32, %arg1: memref<16x32xf32, #tpu.memory_space<vmem>>, %arg2: memref<32x96xf32, #tpu.memory_space<vmem>>, %arg3: memref<32x32xf32, #tpu.memory_space<vmem>>, %arg4: memref<1x32xf32, #tpu.memory_space<vmem>>, %arg5: memref<16x32xf32, #tpu.memory_space<vmem>>, %arg6: memref<16x32xf32, #tpu.memory_space<vmem>>) attributes {dimension_semantics = [#tpu.dimension_semantics<arbitrary>], iteration_bounds = array<i64: 1>, scalar_prefetch = 0 : i64, scratch_operands = 1 : i64, tpu.core_type = #tpu.core_type<tc>, window_params = [{pipeline_mode = #tpu.pipeline_mode<synchronous>, transform_indices = @transform_0, window_bounds = array<i64: 16, 32>}, {pipeline_mode = #tpu.pipeline_mode<synchronous>, transform_indices = @transform_1, window_bounds = array<i64: 32, 96>}, {pipeline_mode = #tpu.pipeline_mode<synchronous>, transform_indices = @transform_2, window_bounds = array<i64: 32, 32>}, {pipeline_mode = #tpu.pipeline_mode<synchronous>, transform_indices = @transform_3, window_bounds = array<i64: 1, 32>}, {pipeline_mode = #tpu.pipeline_mode<synchronous>, transform_indices = @transform_4, window_bounds = array<i64: 16, 32>}]} {
    %c0 = arith.constant 0 : index
    %c0_0 = arith.constant 0 : index
    %0 = vector.load %arg1[%c0, %c0_0] : memref<16x32xf32, #tpu.memory_space<vmem>>, vector<16x32xf32>
    %c0_1 = arith.constant 0 : index
    %c0_2 = arith.constant 0 : index
    %1 = vector.load %arg2[%c0_1, %c0_2] : memref<32x96xf32, #tpu.memory_space<vmem>>, vector<32x96xf32>
    %cst = arith.constant dense<0.000000e+00> : vector<16x96xf32>
    %2 = tpu.matmul %0, %1, %cst {dimension_numbers = #tpu.dot_dimension_numbers<[1], [0], [0], [1], [0, 0, 1, 1], [], []>} : vector<16x32xf32>, vector<32x96xf32>, vector<16x96xf32> -> vector<16x96xf32>
    %3 = tpu.iota {dimensions = array<i32: 0>} : vector<8x8xi32>
    %4 = tpu.iota {dimensions = array<i32: 1>} : vector<8x8xi32>
    %5 = arith.cmpi sle, %4, %3 : vector<8x8xi32>
    %6 = vector.extract_strided_slice %2 {offsets = [0, 0], sizes = [8, 8], strides = [1, 1]} : vector<16x96xf32> to vector<8x8xf32>
    %7 = vector.extract_strided_slice %2 {offsets = [0, 32], sizes = [8, 8], strides = [1, 1]} : vector<16x96xf32> to vector<8x8xf32>
    %8 = vector.extract_strided_slice %2 {offsets = [0, 64], sizes = [8, 8], strides = [1, 1]} : vector<16x96xf32> to vector<8x8xf32>
    %cst_3 = arith.constant dense<0.000000e+00> : vector<8x8xf32>
    %9 = tpu.matmul %6, %7, %cst_3 {dimension_numbers = #tpu.dot_dimension_numbers<[1], [1], [0], [0], [0, 0, 1, 0], [], []>} : vector<8x8xf32>, vector<8x8xf32>, vector<8x8xf32> -> vector<8x8xf32>
    %cst_4 = arith.constant 0.176776692 : f32
    %10 = vector.broadcast %cst_4 : f32 to vector<8x8xf32>
    %11 = arith.mulf %9, %10 : vector<8x8xf32>
    %cst_5 = arith.constant -1.000000e+30 : f32
    %12 = vector.broadcast %cst_5 : f32 to vector<8x8xf32>
    %13 = arith.select %5, %11, %12 : vector<8x8xi1>, vector<8x8xf32>
    %cst_6 = arith.constant dense<0xFF800000> : vector<8xf32>
    %14 = vector.multi_reduction <maximumf>, %13, %cst_6 [1] : vector<8x8xf32> to vector<8xf32>
    %15 = vector.shape_cast %14 : vector<8xf32> to vector<8x1xf32>
    %16 = vector.broadcast %15 : vector<8x1xf32> to vector<8x8xf32>
    %17 = arith.subf %13, %16 : vector<8x8xf32>
    %18 = math.exp %17 : vector<8x8xf32>
    %cst_7 = arith.constant dense<0.000000e+00> : vector<8xf32>
    %19 = vector.multi_reduction <add>, %18, %cst_7 [1] : vector<8x8xf32> to vector<8xf32>
    %20 = vector.shape_cast %19 : vector<8xf32> to vector<8x1xf32>
    %cst_8 = arith.constant dense<0.000000e+00> : vector<8x8xf32>
    %21 = tpu.matmul %18, %8, %cst_8 {dimension_numbers = #tpu.dot_dimension_numbers<[1], [0], [0], [1], [0, 0, 1, 1], [], []>} : vector<8x8xf32>, vector<8x8xf32>, vector<8x8xf32> -> vector<8x8xf32>
    %22 = tpu.reciprocal %20 : vector<8x1xf32> -> vector<8x1xf32>
    %23 = vector.broadcast %22 : vector<8x1xf32> to vector<8x8xf32>
    %24 = arith.mulf %21, %23 : vector<8x8xf32>
    %c0_9 = arith.constant 0 : index
    %c0_10 = arith.constant 0 : index
    %25 = vector.load %arg6[%c0_9, %c0_10] : memref<16x32xf32, #tpu.memory_space<vmem>>, vector<8x8xf32>
    tpu.vector_store %arg6[%c0_9, %c0_10], %24 {strides = array<i32>} : memref<16x32xf32, #tpu.memory_space<vmem>>, vector<8x8xf32>,
    %26 = vector.extract_strided_slice %2 {offsets = [0, 8], sizes = [8, 8], strides = [1, 1]} : vector<16x96xf32> to vector<8x8xf32>
    %27 = vector.extract_strided_slice %2 {offsets = [0, 40], sizes = [8, 8], strides = [1, 1]} : vector<16x96xf32> to vector<8x8xf32>
    %28 = vector.extract_strided_slice %2 {offsets = [0, 72], sizes = [8, 8], strides = [1, 1]} : vector<16x96xf32> to vector<8x8xf32>
    %cst_11 = arith.constant dense<0.000000e+00> : vector<8x8xf32>
    %29 = tpu.matmul %26, %27, %cst_11 {dimension_numbers = #tpu.dot_dimension_numbers<[1], [1], [0], [0], [0, 0, 1, 0], [], []>} : vector<8x8xf32>, vector<8x8xf32>, vector<8x8xf32> -> vector<8x8xf32>
    %cst_12 = arith.constant 0.176776692 : f32
    %30 = vector.broadcast %cst_12 : f32 to vector<8x8xf32>
    %31 = arith.mulf %29, %30 : vector<8x8xf32>
    %cst_13 = arith.constant -1.000000e+30 : f32
    %32 = vector.broadcast %cst_13 : f32 to vector<8x8xf32>
    %33 = arith.select %5, %31, %32 : vector<8x8xi1>, vector<8x8xf32>
    %cst_14 = arith.constant dense<0xFF800000> : vector<8xf32>
    %34 = vector.multi_reduction <maximumf>, %33, %cst_14 [1] : vector<8x8xf32> to vector<8xf32>
    %35 = vector.shape_cast %34 : vector<8xf32> to vector<8x1xf32>
    %36 = vector.broadcast %35 : vector<8x1xf32> to vector<8x8xf32>
    %37 = arith.subf %33, %36 : vector<8x8xf32>
    %38 = math.exp %37 : vector<8x8xf32>
    %cst_15 = arith.constant dense<0.000000e+00> : vector<8xf32>
    %39 = vector.multi_reduction <add>, %38, %cst_15 [1] : vector<8x8xf32> to vector<8xf32>
    %40 = vector.shape_cast %39 : vector<8xf32> to vector<8x1xf32>
    %cst_16 = arith.constant dense<0.000000e+00> : vector<8x8xf32>
    %41 = tpu.matmul %38, %28, %cst_16 {dimension_numbers = #tpu.dot_dimension_numbers<[1], [0], [0], [1], [0, 0, 1, 1], [], []>} : vector<8x8xf32>, vector<8x8xf32>, vector<8x8xf32> -> vector<8x8xf32>
    %42 = tpu.reciprocal %40 : vector<8x1xf32> -> vector<8x1xf32>
    %43 = vector.broadcast %42 : vector<8x1xf32> to vector<8x8xf32>
    %44 = arith.mulf %41, %43 : vector<8x8xf32>
    %c0_17 = arith.constant 0 : index
    %c8 = arith.constant 8 : index
    %45 = vector.load %arg6[%c0_17, %c8] : memref<16x32xf32, #tpu.memory_space<vmem>>, vector<8x8xf32>
    tpu.vector_store %arg6[%c0_17, %c8], %44 {strides = array<i32>} : memref<16x32xf32, #tpu.memory_space<vmem>>, vector<8x8xf32>,
    %46 = vector.extract_strided_slice %2 {offsets = [0, 16], sizes = [8, 8], strides = [1, 1]} : vector<16x96xf32> to vector<8x8xf32>
    %47 = vector.extract_strided_slice %2 {offsets = [0, 48], sizes = [8, 8], strides = [1, 1]} : vector<16x96xf32> to vector<8x8xf32>
    %48 = vector.extract_strided_slice %2 {offsets = [0, 80], sizes = [8, 8], strides = [1, 1]} : vector<16x96xf32> to vector<8x8xf32>
    %cst_18 = arith.constant dense<0.000000e+00> : vector<8x8xf32>
    %49 = tpu.matmul %46, %47, %cst_18 {dimension_numbers = #tpu.dot_dimension_numbers<[1], [1], [0], [0], [0, 0, 1, 0], [], []>} : vector<8x8xf32>, vector<8x8xf32>, vector<8x8xf32> -> vector<8x8xf32>
    %cst_19 = arith.constant 0.176776692 : f32
    %50 = vector.broadcast %cst_19 : f32 to vector<8x8xf32>
    %51 = arith.mulf %49, %50 : vector<8x8xf32>
    %cst_20 = arith.constant -1.000000e+30 : f32
    %52 = vector.broadcast %cst_20 : f32 to vector<8x8xf32>
    %53 = arith.select %5, %51, %52 : vector<8x8xi1>, vector<8x8xf32>
    %cst_21 = arith.constant dense<0xFF800000> : vector<8xf32>
    %54 = vector.multi_reduction <maximumf>, %53, %cst_21 [1] : vector<8x8xf32> to vector<8xf32>
    %55 = vector.shape_cast %54 : vector<8xf32> to vector<8x1xf32>
    %56 = vector.broadcast %55 : vector<8x1xf32> to vector<8x8xf32>
    %57 = arith.subf %53, %56 : vector<8x8xf32>
    %58 = math.exp %57 : vector<8x8xf32>
    %cst_22 = arith.constant dense<0.000000e+00> : vector<8xf32>
    %59 = vector.multi_reduction <add>, %58, %cst_22 [1] : vector<8x8xf32> to vector<8xf32>
    %60 = vector.shape_cast %59 : vector<8xf32> to vector<8x1xf32>
    %cst_23 = arith.constant dense<0.000000e+00> : vector<8x8xf32>
    %61 = tpu.matmul %58, %48, %cst_23 {dimension_numbers = #tpu.dot_dimension_numbers<[1], [0], [0], [1], [0, 0, 1, 1], [], []>} : vector<8x8xf32>, vector<8x8xf32>, vector<8x8xf32> -> vector<8x8xf32>
    %62 = tpu.reciprocal %60 : vector<8x1xf32> -> vector<8x1xf32>
    %63 = vector.broadcast %62 : vector<8x1xf32> to vector<8x8xf32>
    %64 = arith.mulf %61, %63 : vector<8x8xf32>
    %c0_24 = arith.constant 0 : index
    %c16 = arith.constant 16 : index
    %65 = vector.load %arg6[%c0_24, %c16] : memref<16x32xf32, #tpu.memory_space<vmem>>, vector<8x8xf32>
    tpu.vector_store %arg6[%c0_24, %c16], %64 {strides = array<i32>} : memref<16x32xf32, #tpu.memory_space<vmem>>, vector<8x8xf32>,
    %66 = vector.extract_strided_slice %2 {offsets = [0, 24], sizes = [8, 8], strides = [1, 1]} : vector<16x96xf32> to vector<8x8xf32>
    %67 = vector.extract_strided_slice %2 {offsets = [0, 56], sizes = [8, 8], strides = [1, 1]} : vector<16x96xf32> to vector<8x8xf32>
    %68 = vector.extract_strided_slice %2 {offsets = [0, 88], sizes = [8, 8], strides = [1, 1]} : vector<16x96xf32> to vector<8x8xf32>
    %cst_25 = arith.constant dense<0.000000e+00> : vector<8x8xf32>
    %69 = tpu.matmul %66, %67, %cst_25 {dimension_numbers = #tpu.dot_dimension_numbers<[1], [1], [0], [0], [0, 0, 1, 0], [], []>} : vector<8x8xf32>, vector<8x8xf32>, vector<8x8xf32> -> vector<8x8xf32>
    %cst_26 = arith.constant 0.176776692 : f32
    %70 = vector.broadcast %cst_26 : f32 to vector<8x8xf32>
    %71 = arith.mulf %69, %70 : vector<8x8xf32>
    %cst_27 = arith.constant -1.000000e+30 : f32
    %72 = vector.broadcast %cst_27 : f32 to vector<8x8xf32>
    %73 = arith.select %5, %71, %72 : vector<8x8xi1>, vector<8x8xf32>
    %cst_28 = arith.constant dense<0xFF800000> : vector<8xf32>
    %74 = vector.multi_reduction <maximumf>, %73, %cst_28 [1] : vector<8x8xf32> to vector<8xf32>
    %75 = vector.shape_cast %74 : vector<8xf32> to vector<8x1xf32>
    %76 = vector.broadcast %75 : vector<8x1xf32> to vector<8x8xf32>
    %77 = arith.subf %73, %76 : vector<8x8xf32>
    %78 = math.exp %77 : vector<8x8xf32>
    %cst_29 = arith.constant dense<0.000000e+00> : vector<8xf32>
    %79 = vector.multi_reduction <add>, %78, %cst_29 [1] : vector<8x8xf32> to vector<8xf32>
    %80 = vector.shape_cast %79 : vector<8xf32> to vector<8x1xf32>
    %cst_30 = arith.constant dense<0.000000e+00> : vector<8x8xf32>
    %81 = tpu.matmul %78, %68, %cst_30 {dimension_numbers = #tpu.dot_dimension_numbers<[1], [0], [0], [1], [0, 0, 1, 1], [], []>} : vector<8x8xf32>, vector<8x8xf32>, vector<8x8xf32> -> vector<8x8xf32>
    %82 = tpu.reciprocal %80 : vector<8x1xf32> -> vector<8x1xf32>
    %83 = vector.broadcast %82 : vector<8x1xf32> to vector<8x8xf32>
    %84 = arith.mulf %81, %83 : vector<8x8xf32>
    %c0_31 = arith.constant 0 : index
    %c24 = arith.constant 24 : index
    %85 = vector.load %arg6[%c0_31, %c24] : memref<16x32xf32, #tpu.memory_space<vmem>>, vector<8x8xf32>
    tpu.vector_store %arg6[%c0_31, %c24], %84 {strides = array<i32>} : memref<16x32xf32, #tpu.memory_space<vmem>>, vector<8x8xf32>,
    %86 = vector.extract_strided_slice %2 {offsets = [8, 0], sizes = [8, 8], strides = [1, 1]} : vector<16x96xf32> to vector<8x8xf32>
    %87 = vector.extract_strided_slice %2 {offsets = [8, 32], sizes = [8, 8], strides = [1, 1]} : vector<16x96xf32> to vector<8x8xf32>
    %88 = vector.extract_strided_slice %2 {offsets = [8, 64], sizes = [8, 8], strides = [1, 1]} : vector<16x96xf32> to vector<8x8xf32>
    %cst_32 = arith.constant dense<0.000000e+00> : vector<8x8xf32>
    %89 = tpu.matmul %86, %87, %cst_32 {dimension_numbers = #tpu.dot_dimension_numbers<[1], [1], [0], [0], [0, 0, 1, 0], [], []>} : vector<8x8xf32>, vector<8x8xf32>, vector<8x8xf32> -> vector<8x8xf32>
    %cst_33 = arith.constant 0.176776692 : f32
    %90 = vector.broadcast %cst_33 : f32 to vector<8x8xf32>
    %91 = arith.mulf %89, %90 : vector<8x8xf32>
    %cst_34 = arith.constant -1.000000e+30 : f32
    %92 = vector.broadcast %cst_34 : f32 to vector<8x8xf32>
    %93 = arith.select %5, %91, %92 : vector<8x8xi1>, vector<8x8xf32>
    %cst_35 = arith.constant dense<0xFF800000> : vector<8xf32>
    %94 = vector.multi_reduction <maximumf>, %93, %cst_35 [1] : vector<8x8xf32> to vector<8xf32>
    %95 = vector.shape_cast %94 : vector<8xf32> to vector<8x1xf32>
    %96 = vector.broadcast %95 : vector<8x1xf32> to vector<8x8xf32>
    %97 = arith.subf %93, %96 : vector<8x8xf32>
    %98 = math.exp %97 : vector<8x8xf32>
    %cst_36 = arith.constant dense<0.000000e+00> : vector<8xf32>
    %99 = vector.multi_reduction <add>, %98, %cst_36 [1] : vector<8x8xf32> to vector<8xf32>
    %100 = vector.shape_cast %99 : vector<8xf32> to vector<8x1xf32>
    %cst_37 = arith.constant dense<0.000000e+00> : vector<8x8xf32>
    %101 = tpu.matmul %98, %88, %cst_37 {dimension_numbers = #tpu.dot_dimension_numbers<[1], [0], [0], [1], [0, 0, 1, 1], [], []>} : vector<8x8xf32>, vector<8x8xf32>, vector<8x8xf32> -> vector<8x8xf32>
    %102 = tpu.reciprocal %100 : vector<8x1xf32> -> vector<8x1xf32>
    %103 = vector.broadcast %102 : vector<8x1xf32> to vector<8x8xf32>
    %104 = arith.mulf %101, %103 : vector<8x8xf32>
    %c8_38 = arith.constant 8 : index
    %c0_39 = arith.constant 0 : index
    %105 = vector.load %arg6[%c8_38, %c0_39] : memref<16x32xf32, #tpu.memory_space<vmem>>, vector<8x8xf32>
    tpu.vector_store %arg6[%c8_38, %c0_39], %104 {strides = array<i32>} : memref<16x32xf32, #tpu.memory_space<vmem>>, vector<8x8xf32>,
    %106 = vector.extract_strided_slice %2 {offsets = [8, 8], sizes = [8, 8], strides = [1, 1]} : vector<16x96xf32> to vector<8x8xf32>
    %107 = vector.extract_strided_slice %2 {offsets = [8, 40], sizes = [8, 8], strides = [1, 1]} : vector<16x96xf32> to vector<8x8xf32>
    %108 = vector.extract_strided_slice %2 {offsets = [8, 72], sizes = [8, 8], strides = [1, 1]} : vector<16x96xf32> to vector<8x8xf32>
    %cst_40 = arith.constant dense<0.000000e+00> : vector<8x8xf32>
    %109 = tpu.matmul %106, %107, %cst_40 {dimension_numbers = #tpu.dot_dimension_numbers<[1], [1], [0], [0], [0, 0, 1, 0], [], []>} : vector<8x8xf32>, vector<8x8xf32>, vector<8x8xf32> -> vector<8x8xf32>
    %cst_41 = arith.constant 0.176776692 : f32
    %110 = vector.broadcast %cst_41 : f32 to vector<8x8xf32>
    %111 = arith.mulf %109, %110 : vector<8x8xf32>
    %cst_42 = arith.constant -1.000000e+30 : f32
    %112 = vector.broadcast %cst_42 : f32 to vector<8x8xf32>
    %113 = arith.select %5, %111, %112 : vector<8x8xi1>, vector<8x8xf32>
    %cst_43 = arith.constant dense<0xFF800000> : vector<8xf32>
    %114 = vector.multi_reduction <maximumf>, %113, %cst_43 [1] : vector<8x8xf32> to vector<8xf32>
    %115 = vector.shape_cast %114 : vector<8xf32> to vector<8x1xf32>
    %116 = vector.broadcast %115 : vector<8x1xf32> to vector<8x8xf32>
    %117 = arith.subf %113, %116 : vector<8x8xf32>
    %118 = math.exp %117 : vector<8x8xf32>
    %cst_44 = arith.constant dense<0.000000e+00> : vector<8xf32>
    %119 = vector.multi_reduction <add>, %118, %cst_44 [1] : vector<8x8xf32> to vector<8xf32>
    %120 = vector.shape_cast %119 : vector<8xf32> to vector<8x1xf32>
    %cst_45 = arith.constant dense<0.000000e+00> : vector<8x8xf32>
    %121 = tpu.matmul %118, %108, %cst_45 {dimension_numbers = #tpu.dot_dimension_numbers<[1], [0], [0], [1], [0, 0, 1, 1], [], []>} : vector<8x8xf32>, vector<8x8xf32>, vector<8x8xf32> -> vector<8x8xf32>
    %122 = tpu.reciprocal %120 : vector<8x1xf32> -> vector<8x1xf32>
    %123 = vector.broadcast %122 : vector<8x1xf32> to vector<8x8xf32>
    %124 = arith.mulf %121, %123 : vector<8x8xf32>
    %c8_46 = arith.constant 8 : index
    %c8_47 = arith.constant 8 : index
    %125 = vector.load %arg6[%c8_46, %c8_47] : memref<16x32xf32, #tpu.memory_space<vmem>>, vector<8x8xf32>
    tpu.vector_store %arg6[%c8_46, %c8_47], %124 {strides = array<i32>} : memref<16x32xf32, #tpu.memory_space<vmem>>, vector<8x8xf32>,
    %126 = vector.extract_strided_slice %2 {offsets = [8, 16], sizes = [8, 8], strides = [1, 1]} : vector<16x96xf32> to vector<8x8xf32>
    %127 = vector.extract_strided_slice %2 {offsets = [8, 48], sizes = [8, 8], strides = [1, 1]} : vector<16x96xf32> to vector<8x8xf32>
    %128 = vector.extract_strided_slice %2 {offsets = [8, 80], sizes = [8, 8], strides = [1, 1]} : vector<16x96xf32> to vector<8x8xf32>
    %cst_48 = arith.constant dense<0.000000e+00> : vector<8x8xf32>
    %129 = tpu.matmul %126, %127, %cst_48 {dimension_numbers = #tpu.dot_dimension_numbers<[1], [1], [0], [0], [0, 0, 1, 0], [], []>} : vector<8x8xf32>, vector<8x8xf32>, vector<8x8xf32> -> vector<8x8xf32>
    %cst_49 = arith.constant 0.176776692 : f32
    %130 = vector.broadcast %cst_49 : f32 to vector<8x8xf32>
    %131 = arith.mulf %129, %130 : vector<8x8xf32>
    %cst_50 = arith.constant -1.000000e+30 : f32
    %132 = vector.broadcast %cst_50 : f32 to vector<8x8xf32>
    %133 = arith.select %5, %131, %132 : vector<8x8xi1>, vector<8x8xf32>
    %cst_51 = arith.constant dense<0xFF800000> : vector<8xf32>
    %134 = vector.multi_reduction <maximumf>, %133, %cst_51 [1] : vector<8x8xf32> to vector<8xf32>
    %135 = vector.shape_cast %134 : vector<8xf32> to vector<8x1xf32>
    %136 = vector.broadcast %135 : vector<8x1xf32> to vector<8x8xf32>
    %137 = arith.subf %133, %136 : vector<8x8xf32>
    %138 = math.exp %137 : vector<8x8xf32>
    %cst_52 = arith.constant dense<0.000000e+00> : vector<8xf32>
    %139 = vector.multi_reduction <add>, %138, %cst_52 [1] : vector<8x8xf32> to vector<8xf32>
    %140 = vector.shape_cast %139 : vector<8xf32> to vector<8x1xf32>
    %cst_53 = arith.constant dense<0.000000e+00> : vector<8x8xf32>
    %141 = tpu.matmul %138, %128, %cst_53 {dimension_numbers = #tpu.dot_dimension_numbers<[1], [0], [0], [1], [0, 0, 1, 1], [], []>} : vector<8x8xf32>, vector<8x8xf32>, vector<8x8xf32> -> vector<8x8xf32>
    %142 = tpu.reciprocal %140 : vector<8x1xf32> -> vector<8x1xf32>
    %143 = vector.broadcast %142 : vector<8x1xf32> to vector<8x8xf32>
    %144 = arith.mulf %141, %143 : vector<8x8xf32>
    %c8_54 = arith.constant 8 : index
    %c16_55 = arith.constant 16 : index
    %145 = vector.load %arg6[%c8_54, %c16_55] : memref<16x32xf32, #tpu.memory_space<vmem>>, vector<8x8xf32>
    tpu.vector_store %arg6[%c8_54, %c16_55], %144 {strides = array<i32>} : memref<16x32xf32, #tpu.memory_space<vmem>>, vector<8x8xf32>,
    %146 = vector.extract_strided_slice %2 {offsets = [8, 24], sizes = [8, 8], strides = [1, 1]} : vector<16x96xf32> to vector<8x8xf32>
    %147 = vector.extract_strided_slice %2 {offsets = [8, 56], sizes = [8, 8], strides = [1, 1]} : vector<16x96xf32> to vector<8x8xf32>
    %148 = vector.extract_strided_slice %2 {offsets = [8, 88], sizes = [8, 8], strides = [1, 1]} : vector<16x96xf32> to vector<8x8xf32>
    %cst_56 = arith.constant dense<0.000000e+00> : vector<8x8xf32>
    %149 = tpu.matmul %146, %147, %cst_56 {dimension_numbers = #tpu.dot_dimension_numbers<[1], [1], [0], [0], [0, 0, 1, 0], [], []>} : vector<8x8xf32>, vector<8x8xf32>, vector<8x8xf32> -> vector<8x8xf32>
    %cst_57 = arith.constant 0.176776692 : f32
    %150 = vector.broadcast %cst_57 : f32 to vector<8x8xf32>
    %151 = arith.mulf %149, %150 : vector<8x8xf32>
    %cst_58 = arith.constant -1.000000e+30 : f32
    %152 = vector.broadcast %cst_58 : f32 to vector<8x8xf32>
    %153 = arith.select %5, %151, %152 : vector<8x8xi1>, vector<8x8xf32>
    %cst_59 = arith.constant dense<0xFF800000> : vector<8xf32>
    %154 = vector.multi_reduction <maximumf>, %153, %cst_59 [1] : vector<8x8xf32> to vector<8xf32>
    %155 = vector.shape_cast %154 : vector<8xf32> to vector<8x1xf32>
    %156 = vector.broadcast %155 : vector<8x1xf32> to vector<8x8xf32>
    %157 = arith.subf %153, %156 : vector<8x8xf32>
    %158 = math.exp %157 : vector<8x8xf32>
    %cst_60 = arith.constant dense<0.000000e+00> : vector<8xf32>
    %159 = vector.multi_reduction <add>, %158, %cst_60 [1] : vector<8x8xf32> to vector<8xf32>
    %160 = vector.shape_cast %159 : vector<8xf32> to vector<8x1xf32>
    %cst_61 = arith.constant dense<0.000000e+00> : vector<8x8xf32>
    %161 = tpu.matmul %158, %148, %cst_61 {dimension_numbers = #tpu.dot_dimension_numbers<[1], [0], [0], [1], [0, 0, 1, 1], [], []>} : vector<8x8xf32>, vector<8x8xf32>, vector<8x8xf32> -> vector<8x8xf32>
    %162 = tpu.reciprocal %160 : vector<8x1xf32> -> vector<8x1xf32>
    %163 = vector.broadcast %162 : vector<8x1xf32> to vector<8x8xf32>
    %164 = arith.mulf %161, %163 : vector<8x8xf32>
    %c8_62 = arith.constant 8 : index
    %c24_63 = arith.constant 24 : index
    %165 = vector.load %arg6[%c8_62, %c24_63] : memref<16x32xf32, #tpu.memory_space<vmem>>, vector<8x8xf32>
    tpu.vector_store %arg6[%c8_62, %c24_63], %164 {strides = array<i32>} : memref<16x32xf32, #tpu.memory_space<vmem>>, vector<8x8xf32>,
    %c0_64 = arith.constant 0 : index
    %c0_65 = arith.constant 0 : index
    %166 = vector.load %arg6[%c0_64, %c0_65] : memref<16x32xf32, #tpu.memory_space<vmem>>, vector<16x32xf32>
    %c0_66 = arith.constant 0 : index
    %c0_67 = arith.constant 0 : index
    %167 = vector.load %arg3[%c0_66, %c0_67] : memref<32x32xf32, #tpu.memory_space<vmem>>, vector<32x32xf32>
    %cst_68 = arith.constant dense<0.000000e+00> : vector<16x32xf32>
    %168 = tpu.matmul %166, %167, %cst_68 {dimension_numbers = #tpu.dot_dimension_numbers<[1], [0], [0], [1], [0, 0, 1, 1], [], []>} : vector<16x32xf32>, vector<32x32xf32>, vector<16x32xf32> -> vector<16x32xf32>
    %c0_69 = arith.constant 0 : index
    %c0_70 = arith.constant 0 : index
    %169 = vector.load %arg4[%c0_69, %c0_70] : memref<1x32xf32, #tpu.memory_space<vmem>>, vector<1x32xf32>
    %170 = vector.broadcast %169 : vector<1x32xf32> to vector<16x32xf32>
    %171 = arith.addf %168, %170 : vector<16x32xf32>
    %c0_71 = arith.constant 0 : index
    %c0_72 = arith.constant 0 : index
    %172 = vector.load %arg5[%c0_71, %c0_72] : memref<16x32xf32, #tpu.memory_space<vmem>>, vector<16x32xf32>
    tpu.vector_store %arg5[%c0_71, %c0_72], %171 {strides = array<i32>} : memref<16x32xf32, #tpu.memory_space<vmem>>, vector<16x32xf32>,
    return
  }
  func.func @transform_0(%arg0: i32) -> (i32, i32) {
    %c0_i32 = arith.constant 0 : i32
    %c0_i32_0 = arith.constant 0 : i32
    %c0_i32_1 = arith.constant 0 : i32
    return %c0_i32, %c0_i32_0 : i32, i32
  }
  func.func @transform_1(%arg0: i32) -> (i32, i32) {
    %c0_i32 = arith.constant 0 : i32
    %c0_i32_0 = arith.constant 0 : i32
    %c0_i32_1 = arith.constant 0 : i32
    return %c0_i32, %c0_i32_0 : i32, i32
  }
  func.func @transform_2(%arg0: i32) -> (i32, i32) {
    %c0_i32 = arith.constant 0 : i32
    %c0_i32_0 = arith.constant 0 : i32
    %c0_i32_1 = arith.constant 0 : i32
    return %c0_i32, %c0_i32_0 : i32, i32
  }
  func.func @transform_3(%arg0: i32) -> (i32, i32) {
    %c0_i32 = arith.constant 0 : i32
    %c0_i32_0 = arith.constant 0 : i32
    %c0_i32_1 = arith.constant 0 : i32
    return %c0_i32, %c0_i32_0 : i32, i32
  }
  func.func @transform_4(%arg0: i32) -> (i32, i32) {
    %c0_i32 = arith.constant 0 : i32
    %c0_i32_0 = arith.constant 0 : i32
    %c0_i32_1 = arith.constant 0 : i32
    return %c0_i32, %c0_i32_0 : i32, i32
  }
}

</mosaic_0001>

<bundles_post_ra>
// kernel: tpu_custom_call.1
= control target key start
LH: loop header
LB: loop body
LE: loop exit
PB: predicated region body
PF: predicated region fallthrough
CT: control target
= control target key end

     0   :  { %9 = vsyncpa [#allocation4], 0  ;;  %s2273_s0 = inlined_call_operand.hbm [shape: f32[16,32], index: 0, kind: input, shape index: {}]   ;;  %s2274_s1 = inlined_call_operand.hbm [shape: f32[32,96], index: 1, kind: input, shape index: {}]   ;;  %s2275_s2 = inlined_call_operand.hbm [shape: f32[32,32], index: 2, kind: input, shape index: {}]   ;;  %s2276_s3 = inlined_call_operand.vmem [shape: f32[1,32], index: 3, kind: input, shape index: {}]   ;;  %s2277_s4 = inlined_call_operand.hbm [shape: f32[16,32], index: 4, kind: output, shape index: {}]  }
   0x1   :  { %10 = vsyncpa [#allocation7], 0 }
   0x2   :  { %11 = vsyncpa [#allocation5], 0  ;;  %s1974_s15 = smov [#allocation6]   ;;  %s1975_s17 = smov [#allocation3]  }
   0x3   :  { %s29_s16 = sshll.u32 %s1974_s15, 4  ;;  %s17_s18 = sshll.u32 %s1975_s17, 4  ;;  %s30_s16 = int_to_ptr.vmem [resolvable:$true] %s29_s16  ;;  %s2020_s18 = int_to_ptr.vmem [resolvable:$true] %s17_s18 }
   0x4   :  { %s1880_s21 = scalar_lea.hbm %s2274_s1, 512 }
   0x5   :  { %p1881_p0 = scmp.ne.s32.totalorder %s2274_s1, %s1880_s21  ;;  %p1884_p1 = scmp.lt.u32.totalorder %s1880_s21, %s2274_s1 }
   0x7   :  { %p1886_p2 = pnand %p1884_p1, %p1881_p0 }
   0x9   :  { %1889 = shalt.err (!%p1886_p2)
}
   0xa   :  { %s1890_s26 = scalar_lea.vmem %s30_s16, 512  ;;  %p1895_p4 = scmp.lt.s32.totalorder %s30_s16, %s30_s16 }
   0xb   :  { %p1891_p3 = scmp.ne.s32.totalorder %s30_s16, %s1890_s26  ;;  %p1896_p5 = scmp.lt.s32.totalorder %s1890_s26, %s1890_s26 }
   0xd   :  { %p1897_p6 = por %p1896_p5, %p1895_p4 }
   0xf   :  { %p1898_p7 = pnand %p1897_p6, %p1891_p3 }
  0x11   :  { %1901 = shalt.err (!%p1898_p7)
}
  0x12   :  { %s1976_s27 = smov 128   ;;  %s1977_s28 = smov 8  }
  0x13   :  { %35 = dma.hbm_to_vmem [thread:$0]  %s2274_s1, 512, %s30_s16, [#allocation7], %s1976_s27, %s1976_s27, %s1977_s28  }
  0x14   :  { %s1902_s7 = scalar_lea.hbm %s2273_s0, 256 }
  0x15   :  { %p1903_p8 = scmp.ne.s32.totalorder %s2273_s0, %s1902_s7  ;;  %p1906_p9 = scmp.lt.u32.totalorder %s1902_s7, %s2273_s0 }
  0x17   :  { %p1908_p10 = pnand %p1906_p9, %p1903_p8 }
  0x19   :  { %1911 = shalt.err (!%p1908_p10)
}
  0x1a   :  { %s1912_s12 = scalar_lea.vmem %s2020_s18, 256  ;;  %p1917_p12 = scmp.lt.s32.totalorder %s2020_s18, %s2020_s18 }
  0x1b   :  { %p1913_p11 = scmp.ne.s32.totalorder %s2020_s18, %s1912_s12  ;;  %p1918_p13 = scmp.lt.s32.totalorder %s1912_s12, %s1912_s12 }
  0x1d   :  { %p1919_p0 = por %p1918_p13, %p1917_p12 }
  0x1f   :  { %p1920_p1 = pnand %p1919_p0, %p1913_p11 }
  0x21   :  { %1923 = shalt.err (!%p1920_p1)
}
  0x22   :  { %23 = dma.hbm_to_vmem [thread:$0]  %s2273_s0, 256, %s2020_s18, [#allocation4], %s1976_s27, %s1976_s27, %s1977_s28  }
  0x23   :  { %s1978_s14 = smov [#allocation8]   ;;  %s1924_s19 = scalar_lea.hbm %s2275_s2, 512 }
  0x24   :  { %s41_s15 = sshll.u32 %s1978_s14, 4  ;;  %p1925_p2 = scmp.ne.s32.totalorder %s2275_s2, %s1924_s19  ;;  %s42_s15 = int_to_ptr.vmem [resolvable:$true] %s41_s15 }
  0x25   :  { %p1928_p3 = scmp.lt.u32.totalorder %s1924_s19, %s2275_s2 }
  0x27   :  { %p1930_p4 = pnand %p1928_p3, %p1925_p2 }
  0x29   :  { %1933 = shalt.err (!%p1930_p4)
}
  0x2a   :  { %s1934_s24 = scalar_lea.vmem %s42_s15, 512  ;;  %p1939_p6 = scmp.lt.s32.totalorder %s42_s15, %s42_s15 }
  0x2b   :  { %p1935_p5 = scmp.ne.s32.totalorder %s42_s15, %s1934_s24  ;;  %p1940_p7 = scmp.lt.s32.totalorder %s1934_s24, %s1934_s24 }
  0x2d   :  { %p1941_p8 = por %p1940_p7, %p1939_p6 }
  0x2f   :  { %p1942_p9 = pnand %p1941_p8, %p1935_p5 }
  0x31   :  { %1945 = shalt.err (!%p1942_p9)
}
  0x32   :  { %47 = dma.hbm_to_vmem [thread:$0]  %s2275_s2, 512, %s42_s15, [#allocation7], %s1976_s27, %s1976_s27, %s1977_s28  }
  0x33   :  { %1968 = dma.done.wait [#allocation4], 256  }
  0x34   :  { %1969 = vsyncadd [#allocation4], 4294967040 }
  0x35   :  { %1970 = dma.done.wait [#allocation7], 1024  }
  0x36   :  { %1971 = vsyncadd [#allocation7], 4294966272  ;;  %vm65_vm0 = vcmask 261120   ;;  %v61_v0 = vld [vmem:[#allocation6] sm:$0xff]  ;;  %v62_v1 = vld [vmem:[#allocation6 + $0x8] sm:$0xff]  ;;  %v1979_v8 = vmov 0.0   ;;  %v147_v21 = vlaneseq }
  0x37   :  { %v63_v2 = vld [vmem:[#allocation6 + $0x10] sm:$0xff]  ;;  %v1811_v3 = vpack.c.bf16 %v62_v1, %v61_v0  ;;  %v64_v4 = vld [vmem:[#allocation6 + $0x18] sm:$0xff]  ;;  %1720 = vmatprep.subr.mxu1 %v1979_v8  ;;  %vm1980_vm1 = vmmov 0   ;;  %s1981_s2 = smov 64   ;;  %s1982_s25 = smov 96   ;;  %vm155_vm2 = vcmask 64512  }
  0x38   :  { %v59_v5 = vld [vmem:[#allocation3] sm:$0xff]  ;;  %v1815_v6 = vpack.c.bf16 %v64_v4, %v63_v2  ;;  %v60_v7 = vld [vmem:[#allocation3 + $0x8] sm:$0xff]  ;;  %1722 = vmatprep.mubr.msk.f32.mxu1 %vm1980_vm1, %v1979_v8  ;;  %s1983_s26 = smov 88   ;;  %s1984_s29 = smov 120   ;;  %v148_v22 = vshrl.u32 %v147_v21, 7  ;;  %v150_v23 = vand.u32 127, %v147_v21 }
  0x39   :  { %1717 = vmatprep.mubr.msk.f32.mxu0 %vm65_vm0, %v59_v5  ;;  %1812 = vmatprep.subr.bf16.mxu0 %v1811_v3  ;;  %s1985_s30 = smov 80   ;;  %s1986_s5 = smov 112   ;;  %vm491_vm4 = vcmask 130112   ;;  %vm664_vm5 = vcmask 195712   ;;  %vm837_vm6 = vcmask 261312  }
  0x3a   :  { %1814 = vmatpush3.bf16.msra.mxu0 %v1811_v3  ;;  %s1987_s6 = smov 72   ;;  %s1988_s7 = smov 104   ;;  %vm2131_vm3 = vcmp.le.s32.totalorder %v150_v23, %v148_v22 }
  0x3b   :  { %1816 = vmatprep.subr.bf16.mxu0 %v1815_v6  ;;  %s1989_s8 = smov 56   ;;  %s1990_s9 = smov 48  }
  0x3c   :  { %s1991_s10 = smov 40   ;;  %s1992_s11 = smov 16  }
  0x3d   :  { %s1993_s12 = smov 24   ;;  %s1994_s14 = smov [#allocation9]  }
  0x3e   :  { %1818 = vmatpush3.bf16.msra.mxu0 %v1815_v6  ;;  %s1623_s15 = sshll.u32 %s1994_s14, 4  ;;  %s1624_s15 = int_to_ptr.vmem [resolvable:$true] %s1623_s15 }
  0x3f   :  { %1740 = vmatprep.subr.mxu0 %v1979_v8  ;;  %s1946_s16 = scalar_lea.vmem %s1624_s15, 256  ;;  %p1951_p11 = scmp.lt.s32.totalorder %s1624_s15, %s1624_s15 }
  0x40   :  { %p1947_p10 = scmp.ne.s32.totalorder %s1624_s15, %s1946_s16  ;;  %p1952_p12 = scmp.lt.s32.totalorder %s1946_s16, %s1946_s16 }
  0x41   :  { %1718 = vmatmul.mubr.msk.f32.vlgmr.msra.gmra.mrb[0].mxu0 %vm65_vm0, %v60_v7 }
  0x42   :  { %1742 = vmatprep.mubr.msk.f32.mxu0 %vm1980_vm1, %v1979_v8  ;;  %p1953_p13 = por %p1952_p12, %p1951_p11 }
  0x44   :  { %p1954_p0 = pnand %p1953_p13, %p1947_p10 }
 0x114   :  { %v2080_v9 = vpop.f32.mrb[0].mxu0 }
 0x115   :  { %v2082_v10 = vpop.f32.mrb[1].mxu0 }
 0x116   :  { %241 = vrot.lane.b32.xlu1 %v2082_v10, %s1981_s2  ;;  %153 = vrot.lane.b32.xlu0 %v2082_v10, %s1982_s25 }
 0x11a   :  { %322 = vrot.lane.b32.xlu1 %v2082_v10, %s1983_s26 }
 0x11e   :  { %320 = vrot.lane.b32.xlu1 %v2082_v10, %s1984_s29 }
 0x122   :  { %495 = vrot.lane.b32.xlu1 %v2082_v10, %s1985_s30 }
 0x126   :  { %493 = vrot.lane.b32.xlu1 %v2082_v10, %s1986_s5 }
 0x12a   :  { %668 = vrot.lane.b32.xlu1 %v2082_v10, %s1987_s6 }
 0x12e   :  { %666 = vrot.lane.b32.xlu1 %v2082_v10, %s1988_s7 }
 0x132   :  { %840 = vrot.lane.b32.xlu1 %v2080_v9, %s1982_s25 }
 0x136   :  { %1008 = vrot.lane.b32.xlu1 %v2080_v9, %s1983_s26 }
 0x13a   :  { %1180 = vrot.lane.b32.xlu1 %v2080_v9, %s1985_s30 }
 0x13e   :  { %1178 = vrot.lane.b32.xlu1 %v2080_v9, %s1986_s5 }
 0x142   :  { %1352 = vrot.lane.b32.xlu1 %v2080_v9, %s1987_s6 }
 0x146   :  { %1350 = vrot.lane.b32.xlu1 %v2080_v9, %s1988_s7 }
 0x14a   :  { %409 = vrot.lane.b32.xlu1 %v2082_v10, %s1989_s8 }
 0x188   :  { %v242_v11 = vpop.permute.xlu1 %241  ;;  %v154_v12 = vpop.permute.xlu0 %153 }
 0x189   :  { %1721 = vmatpush3.xpose.msk.msra.mxu1 %vm155_vm2, %v154_v12 }
 0x18a   :  { %1725 = vmatprep.subr.mxu1 %v1979_v8 }
 0x18c   :  { %v2104_v13 = vpop.permute.xlu1 %322  ;;  %1723 = vmatmul.mubr.msk.f32.vlgmr.msra.gmra.mrb[0].mxu1 %vm155_vm2, %v2082_v10 }
 0x18d   :  { %1726 = vmatpush3.msra.mxu1 %v242_v11  ;;  %1727 = vmatprep.mubr.msk.f32.mxu1 %vm1980_vm1, %v1979_v8 }
 0x18e   :  { %1730 = vmatprep.subr.mxu1 %v1979_v8 }
 0x190   :  { %v2111_v14 = vpop.permute.xlu1 %320 }
 0x194   :  { %v496_v15 = vpop.permute.xlu1 %495 }
 0x195   :  { %1741 = vmatpush3.xpose.msk.msra.mxu0 %vm155_vm2, %v496_v15 }
 0x196   :  { %1750 = vmatprep.subr.mxu0 %v1979_v8 }
 0x198   :  { %v494_v16 = vpop.permute.xlu1 %493 }
 0x199   :  { %1743 = vmatmul.mubr.msk.f32.vlgmr.msra.gmra.mrb[2].mxu0 %vm155_vm2, %v494_v16 }
 0x19a   :  { %1752 = vmatprep.mubr.msk.f32.mxu0 %vm1980_vm1, %v1979_v8 }
 0x19c   :  { %v669_v17 = vpop.permute.xlu1 %668 }
 0x19d   :  { %1751 = vmatpush3.xpose.msk.msra.mxu0 %vm155_vm2, %v669_v17 }
 0x19e   :  { %1760 = vmatprep.subr.mxu0 %v1979_v8 }
 0x1a0   :  { %v667_v18 = vpop.permute.xlu1 %666 }
 0x1a1   :  { %1753 = vmatmul.mubr.msk.f32.vlgmr.msra.gmra.mrb[4].mxu0 %vm155_vm2, %v667_v18 }
 0x1a2   :  { %1762 = vmatprep.mubr.msk.f32.mxu0 %vm1980_vm1, %v1979_v8 }
 0x1a4   :  { %v841_v19 = vpop.permute.xlu1 %840 }
 0x1a5   :  { %1761 = vmatpush3.xpose.msk.msra.mxu0 %vm155_vm2, %v841_v19 }
 0x1a6   :  { %1770 = vmatprep.subr.mxu0 %v1979_v8 }
 0x1a8   :  { %1763 = vmatmul.mubr.msk.f32.vlgmr.msra.gmra.mrb[6].mxu0 %vm155_vm2, %v2080_v9  ;;  %v1009_v20 = vpop.permute.xlu1 %1008 }
 0x1a9   :  { %1771 = vmatpush3.xpose.msk.msra.mxu0 %vm155_vm2, %v1009_v20  ;;  %1772 = vmatprep.mubr.msk.f32.mxu0 %vm1980_vm1, %v1979_v8 }
 0x1aa   :  { %1780 = vmatprep.subr.mxu0 %v1979_v8 }
 0x1ac   :  { %v1181_v45 = vpop.permute.xlu1 %1180 }
 0x1b0   :  { %v1179_v46 = vpop.permute.xlu1 %1178 }
 0x1b4   :  { %v1353_v51 = vpop.permute.xlu1 %1352 }
 0x1b8   :  { %v1351_v52 = vpop.permute.xlu1 %1350 }
 0x1bc   :  { %v410_v54 = vpop.permute.xlu1 %409 }
 0x25f   :  { %v226_v24 = vpop.f32.mrb[0].mxu1 }
 0x260   :  { %v230_v26 = vmul.f32 0.17677669, %v226_v24  ;;  %v1724_v27 = vpop.f32.mrb[1].mxu1 }
 0x262   :  { %v231_v28 = vsel %vm2131_vm3, %v230_v26, -1e+30 }
 0x263   :  { %v232_v29 = vsel %vm155_vm2, %v231_v28, -inf }
 0x264   :  { %233 = vmax.xlane.f32.xlu0 %v232_v29 }
 0x26c   :  { %v567_v30 = vpop.f32.mrb[2].mxu0 }
 0x26d   :  { %v1744_v31 = vpop.f32.mrb[3].mxu0  ;;  %v571_v39 = vmul.f32 0.17677669, %v567_v30 }
 0x26f   :  { %v2148_v41 = vsel %vm2131_vm3, %v571_v39, -1e+30 }
 0x270   :  { %v573_v42 = vsel %vm155_vm2, %v2148_v41, -inf }
 0x274   :  { %v740_v32 = vpop.f32.mrb[4].mxu0 }
 0x275   :  { %v1754_v33 = vpop.f32.mrb[5].mxu0  ;;  %v744_v40 = vmul.f32 0.17677669, %v740_v32 }
 0x277   :  { %v2154_v43 = vsel %vm2131_vm3, %v744_v40, -1e+30 }
 0x278   :  { %v746_v44 = vsel %vm155_vm2, %v2154_v43, -inf }
 0x27a   :  { %1006 = vrot.lane.b32.xlu0 %v2080_v9, %s1984_s29 }
 0x27b   :  { %v912_v34 = vpop.f32.mrb[6].mxu0 }
 0x27c   :  { %v916_v35 = vmul.f32 0.17677669, %v912_v34  ;;  %v1764_v36 = vpop.f32.mrb[7].mxu0 }
 0x27e   :  { %v2142_v37 = vsel %vm2131_vm3, %v916_v35, -1e+30 }
 0x27f   :  { %v918_v38 = vsel %vm155_vm2, %v2142_v37, -inf }
 0x280   :  { %919 = vmax.xlane.f32.xlu1 %v918_v38 }
 0x299   :  { %574 = vmax.xlane.f32.xlu0 %v573_v42 }
 0x29d   :  { %747 = vmax.xlane.f32.xlu0 %v746_v44 }
 0x2b3   :  { %582 = vrot.lane.b32.xlu0 %v2082_v10, %s1990_s9 }
 0x2f1   :  { %v234_v47 = vpop.xlane.xlu0 %233 }
 0x2f2   :  { %v235_v48 = vsub.f32 %v231_v28, %v234_v47 }
 0x2f4   :  { %v236_v49 = vmul.f32 1.442695, %v235_v48 }
 0x2f5   :  { %v1007_v50 = vpop.permute.xlu0 %1006 }
 0x2f6   :  { %1848 = vpow2.f32 %v236_v49  ;;  %1773 = vmatmul.mubr.msk.f32.vlgmr.msra.gmra.mrb[8].mxu0 %vm155_vm2, %v1007_v50 }
 0x2f7   :  { %1781 = vmatpush3.xpose.msk.msra.mxu0 %vm155_vm2, %v1181_v45  ;;  %1782 = vmatprep.mubr.msk.f32.mxu0 %vm1980_vm1, %v1979_v8 }
 0x2f8   :  { %1790 = vmatprep.subr.mxu0 %v1979_v8 }
 0x2fa   :  { %1783 = vmatmul.mubr.msk.f32.vlgmr.msra.gmra.mrb[10].mxu0 %vm155_vm2, %v1179_v46 }
 0x2fb   :  { %1791 = vmatpush3.xpose.msk.msra.mxu0 %vm155_vm2, %v1353_v51  ;;  %1792 = vmatprep.mubr.msk.f32.mxu0 %vm1980_vm1, %v1979_v8 }
 0x2fe   :  { %1793 = vmatmul.mubr.msk.f32.vlgmr.msra.gmra.mrb[12].mxu0 %vm155_vm2, %v1351_v52 }
 0x300   :  { %v2170_v53 = vpop.eup %1848 }
 0x301   :  { %1728 = vmatmul.mubr.msk.f32.vlgmr.msra.gmra.mrb[2].mxu1 %vm155_vm2, %v2170_v53  ;;  %v238_v52 = vsel %vm155_vm2, %v2170_v53, 0.0 }
 0x302   :  { %1731 = vmatpush3.xpose.msk.msra.mxu1 %vm155_vm2, %v2104_v13  ;;  %1732 = vmatprep.mubr.msk.f32.mxu1 %vm1980_vm1, %v1979_v8 }
 0x303   :  { %1735 = vmatprep.subr.mxu1 %v1979_v8 }
 0x305   :  { %1733 = vmatmul.mubr.msk.f32.vlgmr.msra.gmra.mrb[4].mxu1 %vm155_vm2, %v2111_v14 }
 0x306   :  { %1736 = vmatpush3.msra.mxu1 %v410_v54  ;;  %1737 = vmatprep.mubr.msk.f32.mxu1 %vm1980_vm1, %v1979_v8 }
 0x307   :  { %1745 = vmatprep.subr.mxu1 %v1979_v8 }
 0x30d   :  { %v920_v27 = vpop.xlane.xlu1 %919 }
 0x326   :  { %v575_v16 = vpop.xlane.xlu0 %574 }
 0x327   :  { %v576_v17 = vsub.f32 %v2148_v41, %v575_v16 }
 0x329   :  { %v577_v18 = vmul.f32 1.442695, %v576_v17 }
 0x32a   :  { %v748_v21 = vpop.xlane.xlu0 %747 }
 0x32b   :  { %1850 = vpow2.f32 %v577_v18  ;;  %v1524_v18 = vld [vmem:[#allocation8] sm:$0xff] }
 0x32e   :  { %v583_v22 = vpop.permute.xlu0 %582 }
 0x335   :  { %v1851_v19 = vpop.eup %1850 }
 0x336   :  { %v579_v20 = vsel %vm155_vm2, %v1851_v19, 0.0 }
 0x3c9   :  { %v1080_v55 = vpop.f32.mrb[8].mxu0 }
 0x3ca   :  { %v1084_v56 = vmul.f32 0.17677669, %v1080_v55  ;;  %v1774_v57 = vpop.f32.mrb[9].mxu0 }
 0x3cc   :  { %v1085_v58 = vsel %vm2131_vm3, %v1084_v56, -1e+30 }
 0x3cd   :  { %v1252_v59 = vpop.f32.mrb[10].mxu0  ;;  %v1086_v60 = vsel %vm155_vm2, %v1085_v58, -inf }
 0x3ce   :  { %v1256_v61 = vmul.f32 0.17677669, %v1252_v59  ;;  %1087 = vmax.xlane.f32.xlu0 %v1086_v60  ;;  %v1784_v62 = vpop.f32.mrb[11].mxu0 }
 0x3d0   :  { %v1257_v63 = vsel %vm2131_vm3, %v1256_v61, -1e+30 }
 0x3d1   :  { %v1424_v0 = vpop.f32.mrb[12].mxu0  ;;  %v1258_v1 = vsel %vm155_vm2, %v1257_v63, -inf }
 0x3d2   :  { %v1428_v2 = vmul.f32 0.17677669, %v1424_v0  ;;  %1259 = vmax.xlane.f32.xlu1 %v1258_v1  ;;  %v1794_v3 = vpop.f32.mrb[13].mxu0 }
 0x3d4   :  { %v2190_v4 = vpop.f32.mrb[2].mxu1  ;;  %v1429_v5 = vsel %vm2131_vm3, %v1428_v2, -1e+30 }
 0x3d5   :  { %v1729_v6 = vpop.f32.mrb[3].mxu1  ;;  %v1430_v7 = vsel %vm155_vm2, %v1429_v5, -inf }
 0x3d6   :  { %1431 = vmax.xlane.f32.xlu0 %v1430_v7 }
 0x3d8   :  { %v394_v11 = vpop.f32.mrb[4].mxu1 }
 0x3d9   :  { %v398_v12 = vmul.f32 0.17677669, %v394_v11  ;;  %v1734_v13 = vpop.f32.mrb[5].mxu1 }
 0x3db   :  { %v399_v14 = vsel %vm2131_vm3, %v398_v12, -1e+30 }
 0x3dc   :  { %v400_v15 = vsel %vm155_vm2, %v399_v14, -inf }
 0x3dd   :  { %401 = vmax.xlane.f32.xlu1 %v400_v15 }
 0x3ec   :  { %1267 = vrot.lane.b32.xlu0 %v2080_v9, %s1990_s9 }
 0x3ee   :  { %755 = vrot.lane.b32.xlu1 %v2082_v10, %s1991_s10  ;;  %v749_v10 = vsub.f32 %v2154_v43, %v748_v21 }
 0x3f0   :  { %v750_v25 = vmul.f32 1.442695, %v749_v10  ;;  %v1526_v10 = vld [vmem:[#allocation8 + $0x10] sm:$0xff] }
 0x3f2   :  { %927 = vrot.lane.b32.xlu1 %v2080_v9, %s1981_s2 }
 0x3f6   :  { %1095 = vrot.lane.b32.xlu1 %v2080_v9, %s1989_s8 }
 0x3fa   :  { %1439 = vrot.lane.b32.xlu1 %v2080_v9, %s1991_s10  ;;  %v921_v9 = vsub.f32 %v2142_v37, %v920_v27 }
 0x3fc   :  { %v922_v30 = vmul.f32 1.442695, %v921_v9 }
 0x41e   :  { %580 = vadd.xlane.f32.xlu1 %v579_v20 }
 0x45b   :  { %v1088_v23 = vpop.xlane.xlu0 %1087 }
 0x45c   :  { %v1089_v24 = vsub.f32 %v1085_v58, %v1088_v23  ;;  %v1527_v23 = vld [vmem:[#allocation8 + $0x18] sm:$0xff] }
 0x45e   :  { %v1090_v26 = vmul.f32 1.442695, %v1089_v24  ;;  %v1823_v24 = vpack.c.bf16 %v1527_v23, %v1526_v10 }
 0x45f   :  { %v1260_v31 = vpop.xlane.xlu1 %1259 }
 0x460   :  { %1852 = vpow2.f32 %v1090_v26  ;;  %v1261_v33 = vsub.f32 %v1257_v63, %v1260_v31 }
 0x461   :  { %1854 = vpow2.f32 %v750_v25 }
 0x462   :  { %v1262_v40 = vmul.f32 1.442695, %v1261_v33 }
 0x463   :  { %v1432_v28 = vpop.xlane.xlu0 %1431 }
 0x464   :  { %v1433_v29 = vsub.f32 %v1429_v5, %v1432_v28 }
 0x466   :  { %v1434_v32 = vmul.f32 1.442695, %v1433_v29 }
 0x467   :  { %v1268_v55 = vpop.permute.xlu0 %1267 }
 0x468   :  { %1856 = vpow2.f32 %v1434_v32 }
 0x469   :  { %1858 = vpow2.f32 %v922_v30 }
 0x46a   :  { %v1853_v34 = vpop.eup %1852  ;;  %v402_v35 = vpop.xlane.xlu1 %401 }
 0x46b   :  { %v403_v36 = vsub.f32 %v399_v14, %v402_v35  ;;  %v1092_v38 = vsel %vm155_vm2, %v1853_v34, 0.0  ;;  %v1855_v39 = vpop.eup %1854 }
 0x46c   :  { %1093 = vadd.xlane.f32.xlu0 %v1092_v38  ;;  %v752_v37 = vsel %vm155_vm2, %v1855_v39, 0.0 }
 0x46d   :  { %v404_v41 = vmul.f32 1.442695, %v403_v36 }
 0x46e   :  { %v756_v47 = vpop.permute.xlu1 %755 }
 0x46f   :  { %1860 = vpow2.f32 %v404_v41 }
 0x470   :  { %753 = vadd.xlane.f32.xlu0 %v752_v37  ;;  %1862 = vpow2.f32 %v1262_v40 }
 0x472   :  { %v1857_v42 = vpop.eup %1856  ;;  %v928_v51 = vpop.permute.xlu1 %927 }
 0x473   :  { %v1436_v43 = vsel %vm155_vm2, %v1857_v42, 0.0  ;;  %v1859_v44 = vpop.eup %1858 }
 0x474   :  { %1437 = vadd.xlane.f32.xlu1 %v1436_v43  ;;  %v924_v45 = vsel %vm155_vm2, %v1859_v44, 0.0 }
 0x476   :  { %v1096_v54 = vpop.permute.xlu1 %1095 }
 0x478   :  { %925 = vadd.xlane.f32.xlu1 %v924_v45 }
 0x479   :  { %v1861_v46 = vpop.eup %1860 }
 0x47a   :  { %1738 = vmatmul.mubr.msk.f32.vlgmr.msra.gmra.mrb[6].mxu1 %vm155_vm2, %v1861_v46  ;;  %v406_v48 = vsel %vm155_vm2, %v1861_v46, 0.0  ;;  %v1863_v49 = vpop.eup %1862  ;;  %v1440_v53 = vpop.permute.xlu1 %1439 }
 0x47b   :  { %1746 = vmatpush3.msra.mxu1 %v583_v22  ;;  %407 = vadd.xlane.f32.xlu0 %v406_v48  ;;  %v1264_v50 = vsel %vm155_vm2, %v1863_v49, 0.0 }
 0x47c   :  { %1747 = vmatprep.mubr.msk.f32.mxu1 %vm1980_vm1, %v1979_v8  ;;  %1755 = vmatprep.subr.mxu1 %v1979_v8 }
 0x47e   :  { %1748 = vmatmul.mubr.msk.f32.vlgmr.msra.gmra.mrb[8].mxu1 %vm155_vm2, %v1851_v19  ;;  %v1525_v19 = vld [vmem:[#allocation8 + $0x8] sm:$0xff] }
 0x47f   :  { %1756 = vmatpush3.msra.mxu1 %v756_v47  ;;  %1265 = vadd.xlane.f32.xlu0 %v1264_v50  ;;  %v1819_v22 = vpack.c.bf16 %v1525_v19, %v1524_v18 }
 0x480   :  { %1757 = vmatprep.mubr.msk.f32.mxu1 %vm1980_vm1, %v1979_v8  ;;  %1765 = vmatprep.subr.mxu1 %v1979_v8 }
 0x481   :  { %1820 = vmatprep.subr.bf16.mxu0 %v1819_v22 }
 0x482   :  { %1758 = vmatmul.mubr.msk.f32.vlgmr.msra.gmra.mrb[10].mxu1 %vm155_vm2, %v1855_v39  ;;  %1822 = vmatpush3.bf16.msra.mxu0 %v1819_v22 }
 0x483   :  { %1766 = vmatpush3.msra.mxu1 %v928_v51  ;;  %239 = vadd.xlane.f32.xlu0 %v238_v52 }
 0x484   :  { %1767 = vmatprep.mubr.msk.f32.mxu1 %vm1980_vm1, %v1979_v8  ;;  %1775 = vmatprep.subr.mxu1 %v1979_v8 }
 0x485   :  { %1824 = vmatprep.subr.bf16.mxu0 %v1823_v24 }
 0x486   :  { %1768 = vmatmul.mubr.msk.f32.vlgmr.msra.gmra.mrb[12].mxu1 %vm155_vm2, %v1859_v44  ;;  %1826 = vmatpush3.bf16.msra.mxu0 %v1823_v24  ;;  %v1662_v44 = vld [vmem:[%s2276_s3] ss:$0 sm:$0xff] }
 0x487   :  { %1776 = vmatpush3.msra.mxu1 %v1096_v54  ;;  %1777 = vmatprep.mubr.msk.f32.mxu1 %vm1980_vm1, %v1979_v8 }
 0x488   :  { %1785 = vmatprep.subr.mxu1 %v1979_v8 }
 0x48a   :  { %1778 = vmatmul.mubr.msk.f32.vlgmr.msra.gmra.mrb[14].mxu1 %vm155_vm2, %v1853_v34 }
 0x48b   :  { %1786 = vmatpush3.msra.mxu1 %v1268_v55  ;;  %1787 = vmatprep.mubr.msk.f32.mxu1 %vm1980_vm1, %v1979_v8 }
 0x48c   :  { %1795 = vmatprep.subr.mxu1 %v1979_v8 }
 0x48e   :  { %1788 = vmatmul.mubr.msk.f32.vlgmr.msra.gmra.mrb[16].mxu1 %vm155_vm2, %v1863_v49 }
 0x48f   :  { %1796 = vmatpush3.msra.mxu1 %v1440_v53  ;;  %1797 = vmatprep.mubr.msk.f32.mxu1 %vm1980_vm1, %v1979_v8 }
 0x492   :  { %1798 = vmatmul.mubr.msk.f32.vlgmr.msra.gmra.mrb[18].mxu1 %vm155_vm2, %v1857_v42 }
 0x4ab   :  { %v581_v63 = vpop.xlane.xlu1 %580 }
 0x4f9   :  { %v1094_v56 = vpop.xlane.xlu0 %1093 }
 0x4fd   :  { %v754_v57 = vpop.xlane.xlu0 %753 }
 0x501   :  { %v1438_v0 = vpop.xlane.xlu1 %1437 }
 0x505   :  { %v926_v1 = vpop.xlane.xlu1 %925 }
 0x508   :  { %v408_v58 = vpop.xlane.xlu0 %407 }
 0x50c   :  { %v1266_v59 = vpop.xlane.xlu0 %1265 }
 0x510   :  { %v240_v60 = vpop.xlane.xlu0 %239 }
 0x511   :  { %1864 = vrcp.f32 %v240_v60 }
 0x512   :  { %1866 = vrcp.f32 %v408_v58 }
 0x513   :  { %1868 = vrcp.f32 %v581_v63 }
 0x514   :  { %1870 = vrcp.f32 %v754_v57 }
 0x515   :  { %1872 = vrcp.f32 %v926_v1 }
 0x516   :  { %1874 = vrcp.f32 %v1094_v56 }
 0x517   :  { %1876 = vrcp.f32 %v1266_v59 }
 0x518   :  { %1878 = vrcp.f32 %v1438_v0 }
 0x51b   :  { %v1865_v61 = vpop.eup %1864 }
 0x51c   :  { %v318_v62 = vmul.f32 %v1865_v61, %v2190_v4  ;;  %v1867_v8 = vpop.eup %1866 }
 0x51d   :  { %v1869_v6 = vpop.eup %1868 }
 0x51e   :  { %319 = vst.msk [vmem:[#allocation2] sm:$0xff] %vm155_vm2, %v318_v62  ;;  %v1871_v4 = vpop.eup %1870 }
 0x51f   :  { %v1873_v16 = vpop.eup %1872 }
 0x520   :  { %v1875_v25 = vpop.eup %1874 }
 0x521   :  { %v1877_v28 = vpop.eup %1876 }
 0x522   :  { %v1879_v32 = vpop.eup %1878 }
 0x54d   :  { %v481_v2 = vpop.f32.mrb[6].mxu1 }
 0x54e   :  { %v486_v3 = vmul.f32 %v1867_v8, %v481_v2  ;;  %v1739_v5 = vpop.f32.mrb[7].mxu1 }
 0x550   :  { %488 = vrot.lane.b32.xlu0 %v486_v3, %s1977_s28 }
 0x551   :  { %v654_v7 = vpop.f32.mrb[8].mxu1 }
 0x552   :  { %v659_v11 = vmul.f32 %v1869_v6, %v654_v7  ;;  %v1749_v12 = vpop.f32.mrb[9].mxu1 }
 0x554   :  { %661 = vrot.lane.b32.xlu1 %v659_v11, %s1992_s11 }
 0x555   :  { %v827_v13 = vpop.f32.mrb[10].mxu1 }
 0x556   :  { %v832_v14 = vmul.f32 %v1871_v4, %v827_v13  ;;  %v1759_v15 = vpop.f32.mrb[11].mxu1 }
 0x558   :  { %834 = vrot.lane.b32.xlu1 %v832_v14, %s1993_s12 }
 0x559   :  { %v999_v17 = vpop.f32.mrb[12].mxu1 }
 0x55a   :  { %v1004_v20 = vmul.f32 %v1873_v16, %v999_v17  ;;  %v1769_v21 = vpop.f32.mrb[13].mxu1 }
 0x55c   :  { %1005 = vst.msk [vmem:[#allocation2 + $0x8] sm:$0xff] %vm155_vm2, %v1004_v20 }
 0x55d   :  { %v1167_v26 = vpop.f32.mrb[14].mxu1 }
 0x55e   :  { %v1172_v27 = vmul.f32 %v1875_v25, %v1167_v26  ;;  %v1779_v9 = vpop.f32.mrb[15].mxu1 }
 0x560   :  { %1174 = vrot.lane.b32.xlu1 %v1172_v27, %s1977_s28 }
 0x561   :  { %v1339_v29 = vpop.f32.mrb[16].mxu1 }
 0x562   :  { %v1344_v30 = vmul.f32 %v1877_v28, %v1339_v29  ;;  %v1789_v31 = vpop.f32.mrb[17].mxu1 }
 0x564   :  { %1346 = vrot.lane.b32.xlu0 %v1344_v30, %s1992_s11 }
 0x565   :  { %v1511_v33 = vpop.f32.mrb[18].mxu1 }
 0x566   :  { %v1516_v34 = vmul.f32 %v1879_v32, %v1511_v33  ;;  %v1799_v35 = vpop.f32.mrb[19].mxu1 }
 0x568   :  { %1518 = vrot.lane.b32.xlu1 %v1516_v34, %s1993_s12 }
 0x5c2   :  { %v489_v36 = vpop.permute.xlu0 %488 }
 0x5c3   :  { %492 = vst.msk [vmem:[#allocation2] sm:$0xff] %vm491_vm4, %v489_v36 }
 0x5c6   :  { %v662_v38 = vpop.permute.xlu1 %661 }
 0x5c7   :  { %665 = vst.msk [vmem:[#allocation2] sm:$0xff] %vm664_vm5, %v662_v38 }
 0x5ca   :  { %v835_v39 = vpop.permute.xlu1 %834 }
 0x5cb   :  { %838 = vst.msk [vmem:[#allocation2] sm:$0xff] %vm837_vm6, %v835_v39 }
 0x5d2   :  { %v1175_v40 = vpop.permute.xlu1 %1174  ;;  %v1522_v41 = vld [vmem:[#allocation2] sm:$0xff] }
 0x5d3   :  { %1177 = vst.msk [vmem:[#allocation2 + $0x8] sm:$0xff] %vm491_vm4, %v1175_v40  ;;  %1808 = vmatprep.mubr.msk.f32.mxu0 %vm65_vm0, %v1522_v41 }
 0x5d6   :  { %v1347_v37 = vpop.permute.xlu0 %1346 }
 0x5d7   :  { %1349 = vst.msk [vmem:[#allocation2 + $0x8] sm:$0xff] %vm664_vm5, %v1347_v37 }
 0x5da   :  { %v1519_v42 = vpop.permute.xlu1 %1518 }
 0x5db   :  { %1521 = vst.msk [vmem:[#allocation2 + $0x8] sm:$0xff] %vm837_vm6, %v1519_v42 }
 0x5e2   :  { %v1523_v43 = vld [vmem:[#allocation2 + $0x8] sm:$0xff] }
 0x5e3   :  { %1809 = vmatmul.mubr.msk.f32.vlgmr.msra.gmra.mrb[14].mxu0 %vm65_vm0, %v1523_v43 }
 0x6b6   :  { %v1810_v45 = vpop.f32.mrb[14].mxu0 }
 0x6b7   :  { %v1613_v46 = vadd.f32 %v1810_v45, %v1662_v44  ;;  %v1607_v47 = vpop.f32.mrb[15].mxu0 }
 0x6b8   :  { %v1608_v48 = vadd.f32 %v1662_v44, %v1607_v47 }
 0x6b9   :  { %1617 = vst.msk [vmem:[#allocation9 + $0x8] sm:$0xff] %vm65_vm0, %v1613_v46 }
 0x6ba   :  { %1616 = vst.msk [vmem:[#allocation9] sm:$0xff] %vm65_vm0, %v1608_v48 }
 0x6bb   :  { %1957 = shalt.err (!%p1954_p0)
}
 0x6bc   :  { %s1958_s19 = scalar_lea.hbm %s2277_s4, 256 }
 0x6bd   :  { %p1959_p1 = scmp.ne.s32.totalorder %s2277_s4, %s1958_s19  ;;  %p1962_p2 = scmp.lt.u32.totalorder %s1958_s19, %s2277_s4 }
 0x6bf   :  { %p1964_p3 = pnand %p1962_p2, %p1959_p1 }
 0x6c1   :  { %1967 = shalt.err (!%p1964_p3)
}
 0x6c2   :  { %1629 = dma.vmem_to_hbm [thread:$0]  %s1624_s15, 256, %s2277_s4, [#allocation5], %s1976_s27, %s1976_s27, %s1977_s28  }
 0x6c3   :  { %1972 = dma.done.wait [#allocation5], 256  }
 0x6c4   :  { %1973 = vsyncadd [#allocation5], 4294967040 }
 0x6c5   :  { %1633 = vsyncpa [#allocation4], 1 }
 0x6c6   :  { %1634 = vsyncpa [#allocation7], 1 }
 0x6c7   :  { %1635 = vsyncpa [#allocation5], 1 }

</bundles_post_ra>
